<compile_context>
chip_gen: v7x
topology: tpu7x:2x2x1
jax: 0.10.0
libtpu: 0.0.40
codegen_flags: <defaults>
</compile_context>

<pallas_src>
import jax
import jax.numpy as jnp
from jax.experimental import pallas as pl
from jax.experimental.pallas import tpu as pltpu


def _swish_kernel(x_ref, o_ref):
    xf = x_ref[...].astype(jnp.float32)
    # Exact sigmoid via tanh: single EUP op, no overflow path, bit-accurate
    # enough to match the torch reference at f32 precision.
    sig = 0.5 * (1.0 + jnp.tanh(0.5 * xf))
    o_ref[...] = (xf * sig).astype(o_ref.dtype)


def _cost(n_elems: int, itemsize: int) -> pl.CostEstimate:
    return pl.CostEstimate(
        flops=4 * n_elems,            # mul, add, mul, mul per element
        transcendentals=n_elems,      # one tanh per element
        bytes_accessed=2 * n_elems * itemsize,
    )


def _swish_tiled(x2d: jax.Array, tr: int) -> jax.Array:
    """Grid-tiled launch over a (rows, W) slab; last block may be masked."""
    rows, W = x2d.shape
    itemsize = x2d.dtype.itemsize
    grid_n = pl.cdiv(rows, tr)
    return pl.pallas_call(
        _swish_kernel,
        out_shape=jax.ShapeDtypeStruct((rows, W), x2d.dtype),
        grid_spec=pltpu.PrefetchScalarGridSpec(
            num_scalar_prefetch=0,
            grid=(grid_n,),
            in_specs=[pl.BlockSpec((tr, W), lambda i: (i, 0))],
            out_specs=pl.BlockSpec((tr, W), lambda i: (i, 0)),
        ),
        compiler_params=pltpu.CompilerParams(
            dimension_semantics=("parallel",),
            # 2 in + 2 out double-buffered blocks of up to ~8 MiB fit on
            # v5e/v6e (128 MiB physical) and v7x (64 MiB physical).
            vmem_limit_bytes=32 * 1024 * 1024,
        ),
        cost_estimate=_cost(rows * W, itemsize),
    )(x2d)


def _swish_single_block(x2d: jax.Array) -> jax.Array:
    """Whole array as one VMEM-resident block (small, awkward flat sizes)."""
    r, c = x2d.shape
    return pl.pallas_call(
        _swish_kernel,
        out_shape=jax.ShapeDtypeStruct((r, c), x2d.dtype),
        cost_estimate=_cost(r * c, x2d.dtype.itemsize),
    )(x2d)


def swish(x: jax.Array, *, target_block_bytes: int = 4 * 1024 * 1024) -> jax.Array:
    """Elementwise Swish: x * sigmoid(x). Functionally identical to the torch
    module (the `inplace` flag does not change the value)."""
    orig_shape = x.shape
    dtype = x.dtype
    n = x.size
    if n == 0:
        return x

    itemsize = jnp.dtype(dtype).itemsize
    # Sub-32-bit dtypes pack along sublanes: 8 rows (f32), 16 (bf16/f16), 32 (i8).
    sub = 8 * max(1, 4 // itemsize)

    x_flat = x.reshape(-1)

    # --- Path (a): lane-dense factorization n = rows * W with ZERO padding. ---
    W = None
    for cand in (2048, 1024, 512, 384, 256, 128):
        if n % cand == 0 and (n // cand) % sub == 0:
            W = cand
            break

    if W is not None:
        rows = n // W
        tr = max(sub, (target_block_bytes // (W * itemsize)) // sub * sub)
        tr = min(tr, rows)
        grid_n = pl.cdiv(rows, tr)
        if grid_n > 1 and grid_n % 2 == 1:
            # Best-effort even step count so both v7x TensorCores get equal
            # block counts along the "parallel" axis (no effect on v5e/v6e).
            tr2 = max(sub, pl.cdiv(pl.cdiv(rows, grid_n + 1), sub) * sub)
            if pl.cdiv(rows, tr2) % 2 == 0:
                tr = tr2
        out2d = _swish_tiled(x_flat.reshape(rows, W), tr)
        return out2d.reshape(orig_shape)

    # --- Path (b): awkward flat size but small: one full-extent block, no pad. ---
    if n * itemsize <= 2 * 1024 * 1024:
        out2d = _swish_single_block(x_flat.reshape(1, n))
        return out2d.reshape(orig_shape)

    # --- Path (c): large AND not 128-divisible (rare). Pad only as a fallback. ---
    # TODO(synk): a masked-tail variant could drop this last full pad/slice pass.
    W = 512
    rows = pl.cdiv(pl.cdiv(n, W), sub) * sub
    padded_n = rows * W
    x_pad = jnp.pad(x_flat, (0, padded_n - n))
    tr = max(sub, (target_block_bytes // (W * itemsize)) // sub * sub)
    tr = min(tr, rows)
    out2d = _swish_tiled(x_pad.reshape(rows, W), tr)
    return out2d.reshape(-1)[:n].reshape(orig_shape)


if __name__ == "__main__":
    key = jax.random.PRNGKey(0)

    # 1) Small NCHW activation (typical conv usage of the module): exercises
    #    the zero-pad, divisor-chosen lane-dense tiled path.
    x = jax.random.normal(key, (2, 4, 16, 16), dtype=jnp.float32)
    y = swish(x)
    jax.block_until_ready(y)
    y_ref = x * jax.nn.sigmoid(x)
    assert y.shape == x.shape and y.dtype == x.dtype
    assert jnp.max(jnp.abs(y - y_ref)) < 1e-5

    # 2) Awkward flat size (not divisible by 128): exercises the single
    #    full-extent-block path (no padding, no slicing).
    x2 = jax.random.normal(jax.random.PRNGKey(1), (3, 5, 17, 19), dtype=jnp.float32)
    y2 = swish(x2)
    jax.block_until_ready(y2)
    y2_ref = x2 * jax.nn.sigmoid(x2)
    assert y2.shape == x2.shape and y2.dtype == x2.dtype
    assert jnp.max(jnp.abs(y2 - y2_ref)) < 1e-5

    # 3) Multi-step grid (small tensor, small block target): exercises the
    #    pipelined, megacore-parallel grid with an even step count.
    x3 = jax.random.normal(jax.random.PRNGKey(2), (4, 8, 32, 32), dtype=jnp.float32)
    y3 = swish(x3, target_block_bytes=64 * 1024)
    jax.block_until_ready(y3)
    y3_ref = x3 * jax.nn.sigmoid(x3)
    assert y3.shape == x3.shape and y3.dtype == x3.dtype
    assert jnp.max(jnp.abs(y3 - y3_ref)) < 1e-5

    print("KERNEL_OK")
</pallas_src>

<mosaic_0001>
module attributes {stable_mosaic.version = 11 : i64} {
  func.func @_swish_kernel(%arg0: i32, %arg1: memref<8x256xf32, #tpu.memory_space<vmem>>, %arg2: memref<8x256xf32, #tpu.memory_space<vmem>>) attributes {dimension_semantics = [#tpu.dimension_semantics<parallel>], iteration_bounds = array<i64: 1>, scalar_prefetch = 0 : i64, scratch_operands = 0 : i64, tpu.core_type = #tpu.core_type<tc>, window_params = [{transform_indices = @transform_0, window_bounds = array<i64: 8, 256>}, {transform_indices = @transform_1, window_bounds = array<i64: 8, 256>}]} {
    %c0 = arith.constant 0 : index
    %c0_0 = arith.constant 0 : index
    %0 = vector.load %arg1[%c0, %c0_0] : memref<8x256xf32, #tpu.memory_space<vmem>>, vector<8x256xf32>
    %cst = arith.constant 5.000000e-01 : f32
    %1 = vector.broadcast %cst : f32 to vector<8x256xf32>
    %2 = arith.mulf %1, %0 : vector<8x256xf32>
    %3 = math.tanh %2 : vector<8x256xf32>
    %cst_1 = arith.constant 1.000000e+00 : f32
    %4 = vector.broadcast %cst_1 : f32 to vector<8x256xf32>
    %5 = arith.addf %4, %3 : vector<8x256xf32>
    %cst_2 = arith.constant 5.000000e-01 : f32
    %6 = vector.broadcast %cst_2 : f32 to vector<8x256xf32>
    %7 = arith.mulf %6, %5 : vector<8x256xf32>
    %8 = arith.mulf %0, %7 : vector<8x256xf32>
    %c0_3 = arith.constant 0 : index
    %c0_4 = arith.constant 0 : index
    %9 = vector.load %arg2[%c0_3, %c0_4] : memref<8x256xf32, #tpu.memory_space<vmem>>, vector<8x256xf32>
    tpu.vector_store %arg2[%c0_3, %c0_4], %8 {strides = array<i32>} : memref<8x256xf32, #tpu.memory_space<vmem>>, vector<8x256xf32>,
    return
  }
  func.func @transform_0(%arg0: i32) -> (i32, i32) {
    %c0_i32 = arith.constant 0 : i32
    %c0_i32_0 = arith.constant 0 : i32
    return %arg0, %c0_i32 : i32, i32
  }
  func.func @transform_1(%arg0: i32) -> (i32, i32) {
    %c0_i32 = arith.constant 0 : i32
    %c0_i32_0 = arith.constant 0 : i32
    return %arg0, %c0_i32 : i32, i32
  }
}

</mosaic_0001>

<bundles_post_ra>
// kernel: tpu_custom_call.1
= control target key start
LH: loop header
LB: loop body
LE: loop exit
PB: predicated region body
PF: predicated region fallthrough
CT: control target
= control target key end

     0   :  { %6 = vsyncpa [#allocation3], 0  ;;  %s140_s0 = inlined_call_operand.hbm [shape: f32[8,256], index: 0, kind: input, shape index: {}]   ;;  %s141_s1 = inlined_call_operand.hbm [shape: f32[8,256], index: 1, kind: output, shape index: {}]  }
   0x1   :  { %7 = vsyncpa [#allocation4], 0  ;;  %s104_s6 = smov [#allocation2]   ;;  %s56_s10 = scalar_lea.hbm %s140_s0, 256 }
   0x2   :  { %s14_s7 = sshll.u32 %s104_s6, 4  ;;  %p57_p0 = scmp.ne.s32.totalorder %s140_s0, %s56_s10  ;;  %s15_s7 = int_to_ptr.vmem [resolvable:$true] %s14_s7 }
   0x3   :  { %p60_p1 = scmp.lt.u32.totalorder %s56_s10, %s140_s0 }
   0x5   :  { %p62_p2 = pnand %p60_p1, %p57_p0 }
   0x7   :  { %65 = shalt.err (!%p62_p2)
}
   0x8   :  { %s66_s15 = scalar_lea.vmem %s15_s7, 256  ;;  %p71_p4 = scmp.lt.s32.totalorder %s15_s7, %s15_s7 }
   0x9   :  { %p67_p3 = scmp.ne.s32.totalorder %s15_s7, %s66_s15  ;;  %p72_p5 = scmp.lt.s32.totalorder %s66_s15, %s66_s15 }
   0xb   :  { %p73_p6 = por %p72_p5, %p71_p4 }
   0xd   :  { %p74_p7 = pnand %p73_p6, %p67_p3 }
   0xf   :  { %77 = shalt.err (!%p74_p7)
}
  0x10   :  { %17 = dma.hbm_to_vmem [thread:$0]  %s140_s0, 256, %s15_s7, [#allocation3]  }
  0x11   :  { %100 = dma.done.wait [#allocation3], 256  }
  0x12   :  { %101 = vsyncadd [#allocation3], 4294967040  ;;  %v21_v0 = vld [vmem:[#allocation2] sm:$0xff]  ;;  %v22_v1 = vld [vmem:[#allocation2 + $0x8] sm:$0xff]  ;;  %s105_s18 = smov [#allocation5]  }
  0x13   :  { %v23_v2 = vmul.f32 0.5, %v21_v0  ;;  %v24_v3 = vmul.f32 0.5, %v22_v1  ;;  %s41_s19 = sshll.u32 %s105_s18, 4  ;;  %s42_s19 = int_to_ptr.vmem [resolvable:$true] %s41_s19 }
  0x14   :  { %s78_s0 = scalar_lea.vmem %s42_s19, 256  ;;  %p83_p9 = scmp.lt.s32.totalorder %s42_s19, %s42_s19 }
  0x15   :  { %52 = vtanh.f32 %v23_v2  ;;  %p79_p8 = scmp.ne.s32.totalorder %s42_s19, %s78_s0  ;;  %p84_p10 = scmp.lt.s32.totalorder %s78_s0, %s78_s0 }
  0x16   :  { %54 = vtanh.f32 %v24_v3 }
  0x17   :  { %p85_p11 = por %p84_p10, %p83_p9 }
  0x19   :  { %p86_p12 = pnand %p85_p11, %p79_p8 }
  0x1f   :  { %v53_v4 = vpop.eup %52 }
  0x20   :  { %v55_v5 = vpop.eup %54  ;;  %v27_v6 = vadd.f32 1.0, %v53_v4 }
  0x21   :  { %v28_v7 = vadd.f32 1.0, %v55_v5 }
  0x22   :  { %v29_v8 = vmul.f32 0.5, %v27_v6 }
  0x23   :  { %v30_v9 = vmul.f32 0.5, %v28_v7 }
  0x24   :  { %v31_v10 = vmul.f32 %v29_v8, %v21_v0 }
  0x25   :  { %v32_v11 = vmul.f32 %v30_v9, %v22_v1 }
  0x26   :  { %33 = vst [vmem:[#allocation5] sm:$0xff] %v31_v10 }
  0x27   :  { %34 = vst [vmem:[#allocation5 + $0x8] sm:$0xff] %v32_v11 }
  0x28   :  { %89 = shalt.err (!%p86_p12)
}
  0x29   :  { %s90_s22 = scalar_lea.hbm %s141_s1, 256 }
  0x2a   :  { %p91_p13 = scmp.ne.s32.totalorder %s141_s1, %s90_s22  ;;  %p94_p0 = scmp.lt.u32.totalorder %s90_s22, %s141_s1 }
  0x2c   :  { %p96_p1 = pnand %p94_p0, %p91_p13 }
  0x2e   :  { %99 = shalt.err (!%p96_p1)
}
  0x2f   :  { %44 = dma.vmem_to_hbm [thread:$0]  %s42_s19, 256, %s141_s1, [#allocation4]  }
  0x30   :  { %102 = dma.done.wait [#allocation4], 256  }
  0x31   :  { %103 = vsyncadd [#allocation4], 4294967040 }
  0x32   :  { %48 = vsyncpa [#allocation3], 1 }
  0x33   :  { %49 = vsyncpa [#allocation4], 1 }

</bundles_post_ra>
